<compile_context>
chip_gen: v7x
topology: tpu7x:2x2x1
jax: 0.10.0
libtpu: 0.0.40
codegen_flags: <defaults>
</compile_context>

<pallas_src>
import functools
import math

import jax
import jax.numpy as jnp
from jax.experimental import pallas as pl
from jax.experimental.pallas import tpu as pltpu


# ----------------------------------------------------------------------------
# Deterministic parameter init for the (unused-in-forward) Patchifier.Linear
# ----------------------------------------------------------------------------
def init_vonet_params(key):
    k_w, k_b = jax.random.split(key)
    # nn.Linear(20, 4): weight (4, 20), bias (4,)
    bound = 1.0 / (20.0 ** 0.5)
    w = jax.random.uniform(k_w, (4, 20), jnp.float32, -bound, bound)
    b = jax.random.uniform(k_b, (4,), jnp.float32, -bound, bound)
    # TODO(synk): Patchifier.linear is initialized for __init__ fidelity only;
    # VOnet.forward never uses it (matches the PyTorch module).
    return {"patchify": {"linear": {"weight": w, "bias": b}}, "dim": 10}


# ----------------------------------------------------------------------------
# Pallas kernel: elementwise x + dim (dim baked as an immediate constant)
# ----------------------------------------------------------------------------
def _add_dim_kernel(x_ref, o_ref, *, dim):
    o_ref[...] = x_ref[...] + jnp.asarray(dim, dtype=o_ref.dtype)


# Tuning knobs
_LANE_CANDIDATES = (4096, 2048, 1024, 512, 256, 128)  # wide lane-dense last dim
_TARGET_BLOCK_BYTES = 4 << 20   # ~4 MiB/block/array; <=16 MiB double-buffered
_PALLAS_MIN_BYTES = 4 << 20     # below this, the plain fused XLA add wins


def _add_dim_pallas_2d(x2d, dim):
    rows, lanes = x2d.shape
    itemsize = x2d.dtype.itemsize
    row_bytes = lanes * itemsize
    total_bytes = rows * row_bytes

    # Dtype-aware sublane granularity (packed rows per 32-bit sublane word):
    #   f32 -> 8, bf16/f16 -> 16, int8/fp8 -> 32.  Keeps vld/vst unmasked.
    gran = 8 * max(1, 4 // itemsize)

    # Block sizing: ~4 MiB per block per array, but keep the grid >= ~4 blocks
    # so v7x's two TensorCores both stream the parallel axis and per-core
    # double-buffering has work to overlap.
    target_bytes = min(_TARGET_BLOCK_BYTES, max(total_bytes // 4, gran * row_bytes))
    tile_r = max(gran, (target_bytes // row_bytes) // gran * gran)

    if tile_r >= rows:
        tile_r = rows  # whole array in a single block (full dims are legal)
    else:
        # Prefer a tile_r that divides rows so the last block is not a small
        # masked remainder; if none exists, the masked final block is correct.
        for cand in range(tile_r, gran - 1, -gran):
            if rows % cand == 0:
                tile_r = cand
                break

    grid = pl.cdiv(rows, tile_r)
    kernel = functools.partial(_add_dim_kernel, dim=dim)
    return pl.pallas_call(
        kernel,
        out_shape=jax.ShapeDtypeStruct((rows, lanes), x2d.dtype),
        grid=(grid,),
        in_specs=[pl.BlockSpec((tile_r, lanes), lambda i: (i, 0))],
        out_specs=pl.BlockSpec((tile_r, lanes), lambda i: (i, 0)),
        input_output_aliases={0: 0},
        cost_estimate=pl.CostEstimate(
            flops=rows * lanes,
            transcendentals=0,
            bytes_accessed=2 * total_bytes,
        ),
        compiler_params=pltpu.CompilerParams(
            dimension_semantics=("parallel",),
            vmem_limit_bytes=32 * 1024 * 1024,
        ),
    )(x2d)


@functools.partial(jax.jit, static_argnames=("dim", "force_pallas"),
                   donate_argnums=(0,))
def _vonet_forward_impl(x, *, dim, force_pallas):
    orig_shape = x.shape
    total = math.prod(orig_shape)
    nbytes = total * x.dtype.itemsize

    # Largest multiple-of-128 lane width that divides the element count.
    lanes = next((c for c in _LANE_CANDIDATES if total % c == 0), None)

    # A scalar add is pure HBM traffic; XLA's fused add already hits roofline
    # with zero reshape plumbing.  Route through Pallas only when the slab is
    # lane-dense and large enough (or when explicitly forced for testing).
    # Ragged element counts (not a multiple of 128) always take the XLA path:
    # no pad/compute/slice round trip (that would triple HBM traffic).
    if lanes is None or (not force_pallas and nbytes < _PALLAS_MIN_BYTES):
        return x + jnp.asarray(dim, x.dtype)

    x2d = jnp.reshape(x, (total // lanes, lanes))
    out2d = _add_dim_pallas_2d(x2d, dim)
    return jnp.reshape(out2d, orig_shape)


def vonet_forward(params, x, *, force_pallas=False):
    """VOnet.forward: returns x + self.dim (Patchifier params unused, as in PyTorch).

    NOTE: the input buffer is donated and aliased into the output; callers must
    not reuse `x` after this call.
    """
    return _vonet_forward_impl(x, dim=int(params["dim"]), force_pallas=force_pallas)


# ----------------------------------------------------------------------------
# Main
# ----------------------------------------------------------------------------
if __name__ == "__main__":
    key = jax.random.PRNGKey(0)
    params = init_vonet_params(key)

    # 1) Small NCHW input, consistent with a vision-odometry style module.
    #    Forced through the Pallas path so the kernel is exercised; the
    #    reference is computed first because the forward donates its input.
    x = jax.random.normal(jax.random.PRNGKey(1), (2, 4, 16, 16), jnp.float32)
    ref = jax.block_until_ready(x + 10.0)
    out = jax.block_until_ready(vonet_forward(params, x, force_pallas=True))
    assert out.shape == ref.shape
    assert jnp.allclose(out, ref, atol=1e-6), "small-input mismatch vs reference"

    # 2) Larger input (8 MiB): default dispatch takes the Pallas path with a
    #    4-block parallel grid (2 MiB blocks), double-buffered and aliased.
    xb = jax.random.normal(jax.random.PRNGKey(2), (8, 8, 128, 256), jnp.float32)
    refb = jax.block_until_ready(xb + 10.0)
    outb = jax.block_until_ready(vonet_forward(params, xb))
    assert outb.shape == refb.shape
    assert jnp.allclose(outb, refb, atol=1e-6), "large-input mismatch vs reference"

    # 3) Row count not divisible by the tile size: exercises the masked final
    #    grid block combined with the HBM-aliased output.
    xr = jax.random.normal(jax.random.PRNGKey(3), (13, 128), jnp.float32)
    refr = jax.block_until_ready(xr + 10.0)
    outr = jax.block_until_ready(vonet_forward(params, xr, force_pallas=True))
    assert outr.shape == refr.shape
    assert jnp.allclose(outr, refr, atol=1e-6), "ragged-rows mismatch vs reference"

    # 4) bf16 input: exercises the dtype-aware sublane rounding (tile_r % 16).
    xh = jax.random.normal(jax.random.PRNGKey(4), (64, 128, 128)).astype(jnp.bfloat16)
    refh = jax.block_until_ready(xh + jnp.asarray(10, jnp.bfloat16))
    outh = jax.block_until_ready(vonet_forward(params, xh, force_pallas=True))
    assert outh.shape == refh.shape
    assert jnp.allclose(outh.astype(jnp.float32), refh.astype(jnp.float32),
                        atol=1e-1), "bf16 mismatch vs reference"

    # 5) Ragged element count (not a multiple of 128): plain XLA path.
    xg = jax.random.normal(jax.random.PRNGKey(5), (5, 7, 9), jnp.float32)
    refg = jax.block_until_ready(xg + 10.0)
    outg = jax.block_until_ready(vonet_forward(params, xg))
    assert outg.shape == refg.shape
    assert jnp.allclose(outg, refg, atol=1e-6), "ragged-total mismatch vs reference"

    print("KERNEL_OK")
</pallas_src>

<mosaic_0001>
module attributes {stable_mosaic.version = 11 : i64} {
  func.func @_add_dim_kernel(%arg0: i32, %arg1: memref<1x2048xf32, #tpu.memory_space<vmem>>, %arg2: memref<1x2048xf32, #tpu.memory_space<vmem>>) attributes {dimension_semantics = [#tpu.dimension_semantics<parallel>], iteration_bounds = array<i64: 1>, scalar_prefetch = 0 : i64, scratch_operands = 0 : i64, tpu.core_type = #tpu.core_type<tc>, window_params = [{transform_indices = @transform_0, window_bounds = array<i64: 1, 2048>}, {transform_indices = @transform_1, window_bounds = array<i64: 1, 2048>}]} {
    %c0 = arith.constant 0 : index
    %c0_0 = arith.constant 0 : index
    %0 = vector.load %arg1[%c0, %c0_0] : memref<1x2048xf32, #tpu.memory_space<vmem>>, vector<1x2048xf32>
    %cst = arith.constant 1.000000e+01 : f32
    %1 = vector.broadcast %cst : f32 to vector<1x2048xf32>
    %2 = arith.addf %0, %1 : vector<1x2048xf32>
    %c0_1 = arith.constant 0 : index
    %c0_2 = arith.constant 0 : index
    %3 = vector.load %arg2[%c0_1, %c0_2] : memref<1x2048xf32, #tpu.memory_space<vmem>>, vector<1x2048xf32>
    tpu.vector_store %arg2[%c0_1, %c0_2], %2 {strides = array<i32>} : memref<1x2048xf32, #tpu.memory_space<vmem>>, vector<1x2048xf32>,
    return
  }
  func.func @transform_0(%arg0: i32) -> (i32, i32) {
    %c0_i32 = arith.constant 0 : i32
    %c0_i32_0 = arith.constant 0 : i32
    return %arg0, %c0_i32 : i32, i32
  }
  func.func @transform_1(%arg0: i32) -> (i32, i32) {
    %c0_i32 = arith.constant 0 : i32
    %c0_i32_0 = arith.constant 0 : i32
    return %arg0, %c0_i32 : i32, i32
  }
}

</mosaic_0001>

<bundles_post_ra>
// kernel: _vonet_forward_impl.1
= control target key start
LH: loop header
LB: loop body
LE: loop exit
PB: predicated region body
PF: predicated region fallthrough
CT: control target
= control target key end

     0   :  { %s40_s0 = inlined_call_operand.vmem [shape: f32[1,2048], index: 0, kind: input, shape index: {}, may-alias: {0,1}]   ;;  %s41_s1 = inlined_call_operand.vmem [shape: f32[1,2048], index: 1, kind: output, shape index: {}, may-alias: {0,1}]  }
   0x1   :  { %v8_v0 = vld [vmem:[%s40_s0] sm:$0xff]  ;;  %v9_v1 = vld [vmem:[%s40_s0 + $0x8] sm:$0xff] }
   0x2   :  { %v10_v2 = vadd.f32 10.0, %v8_v0  ;;  %v11_v3 = vadd.f32 10.0, %v9_v1 }
   0x4   :  { %12 = vst [vmem:[%s41_s1] sm:$0xff] %v10_v2  ;;  %13 = vst [vmem:[%s41_s1 + $0x8] sm:$0xff] %v11_v3 }

</bundles_post_ra>
